<compile_context>
chip_gen: v5e
topology: v5e:2x2
jax: 0.10.0
libtpu: 0.0.40
codegen_flags: <defaults>
</compile_context>

<pallas_src>
import math

import jax
import jax.numpy as jnp
from jax.experimental import pallas as pl
from jax.experimental.pallas import tpu as pltpu


# ----------------------------------------------------------------------------
# Fused feature-major 3-layer MLP kernel:
#   out = Wo @ (Wh @ relu(Wi @ x + bi) + bh) + bo          (all (feat, rows))
# ----------------------------------------------------------------------------
def _make_ann_kernel(matmul_dtype):
    def kernel(x_ref, wi_ref, bi_ref, wh_ref, bh_ref, wo_ref, bo_ref, out_ref):
        x = x_ref[...].astype(matmul_dtype)                       # (nx, T)
        h1 = jnp.maximum(
            jnp.dot(wi_ref[...].astype(matmul_dtype), x,
                    preferred_element_type=jnp.float32)
            + bi_ref[...], 0.0)                                   # (H, T)
        h2 = (jnp.dot(wh_ref[...].astype(matmul_dtype),
                      h1.astype(matmul_dtype),
                      preferred_element_type=jnp.float32)
              + bh_ref[...])                                      # (H, T)
        y = (jnp.dot(wo_ref[...].astype(matmul_dtype),
                     h2.astype(matmul_dtype),
                     preferred_element_type=jnp.float32)
             + bo_ref[...])                                       # (ny, T)
        out_ref[...] = y.astype(out_ref.dtype)
    return kernel


def _round_up(v, m):
    return ((v + m - 1) // m) * m


def ann_forward(x, kp, *, tile_n=4096, matmul_dtype=jnp.float32):
    """Fused AnnModel forward.

    x : (nt, ngrid, nx) time-major input.
    kp: PyTorch-layout weights wi (H,nx), wh (H,H), wo (ny,H) and column
        biases bi (H,1), bh (H,1), bo (ny,1).
    """
    nt, ngrid, nx = x.shape
    H = kp["wi"].shape[0]
    ny = kp["wo"].shape[0]
    N = nt * ngrid

    # Feature-major (lane-dense) layout: features on sublanes, rows on lanes.
    # nx / H / ny are tiny, so row-major tiles would be 3-32x lane-sparse;
    # transposing the small x / out slabs wrapper-side makes every kernel
    # operand dense along the 128-lane axis (layout plumbing, not compute).
    xt = jnp.swapaxes(x.reshape(N, nx).astype(jnp.float32), 0, 1)    # (nx, N)

    # ---- row-tile selection -------------------------------------------------
    if N <= 256:
        tile = N                      # single full-array block, nothing padded
    else:
        tile = min(int(tile_n), _round_up(N, 256))
        tile = max(256, _round_up(tile, 256))
        if pl.cdiv(N, tile) < 2:
            # Keep >=2 grid steps so v7x's two TensorCores both get a shard.
            tile = max(256, _round_up(pl.cdiv(N, 2), 256))
    grid = pl.cdiv(N, tile)           # ragged last block padded by Pallas

    # ---- VMEM budget: double-buffered x/out blocks + resident weights +
    #      headroom for h1/h2 spills.  Capped at 64 MiB (v7x physical). -------
    weight_bytes = 4 * (H * nx + H * H + ny * H + 2 * H + ny)
    block_bytes = 4 * tile * (2 * (nx + ny) + 4 * H)
    vmem_limit = int(min(max(2 * (2 * weight_bytes + block_bytes), 32 << 20),
                         64 << 20))

    # TODO(synk): if input DMA is still exposed on v7x after tile sweep, add
    #             pipeline_mode=pl.Buffered(3) to the x BlockSpec.
    out_t = pl.pallas_call(
        _make_ann_kernel(matmul_dtype),
        out_shape=jax.ShapeDtypeStruct((ny, N), jnp.float32),
        grid=(grid,),
        in_specs=[
            pl.BlockSpec((nx, tile), lambda i: (0, i)),   # x block (per step)
            pl.BlockSpec((H, nx), lambda i: (0, 0)),      # Wi (resident)
            pl.BlockSpec((H, 1), lambda i: (0, 0)),       # bi
            pl.BlockSpec((H, H), lambda i: (0, 0)),       # Wh
            pl.BlockSpec((H, 1), lambda i: (0, 0)),       # bh
            pl.BlockSpec((ny, H), lambda i: (0, 0)),      # Wo
            pl.BlockSpec((ny, 1), lambda i: (0, 0)),      # bo
        ],
        out_specs=pl.BlockSpec((ny, tile), lambda i: (0, i)),
        compiler_params=pltpu.CompilerParams(
            dimension_semantics=("parallel",),
            vmem_limit_bytes=vmem_limit),
    )(xt, kp["wi"], kp["bi"], kp["wh"], kp["bh"], kp["wo"], kp["bo"])

    return jnp.swapaxes(out_t, 0, 1).reshape(nt, ngrid, ny)


# ----------------------------------------------------------------------------
# Pure-JAX reference mirroring the PyTorch per-timestep loop semantics.
# ----------------------------------------------------------------------------
def reference_forward(x, p):
    hp = jax.lax.Precision.HIGHEST

    def step(xt):
        ht = jnp.maximum(
            jnp.dot(xt, p["W_i2h"].T, precision=hp) + p["b_i2h"], 0.0)
        ht2 = jnp.dot(ht, p["W_h2h"].T, precision=hp) + p["b_h2h"]
        return jnp.dot(ht2, p["W_h2o"].T, precision=hp) + p["b_h2o"]

    return jax.vmap(step)(x)          # loop over t, no carry — same as PyTorch


# ----------------------------------------------------------------------------
if __name__ == "__main__":
    nx, hiddenSize, ny = 4, 32, 2
    H = hiddenSize

    key = jax.random.PRNGKey(0)
    ks = jax.random.split(key, 8)

    def u(k, shape, fan_in):
        s = 1.0 / math.sqrt(fan_in)
        return jax.random.uniform(k, shape, jnp.float32, -s, s)

    # PyTorch-layout parameters (nn.Linear default-style init, deterministic).
    p = dict(
        W_i2h=u(ks[0], (H, nx), nx),
        b_i2h=u(ks[1], (H,), nx),
        W_h2h=u(ks[2], (H, H), H),
        b_h2h=u(ks[3], (H,), H),
        W_h2o=u(ks[4], (ny, H), H),
        b_h2o=u(ks[5], (ny,), H),
    )

    # Kernel-layout parameters: PyTorch weight layout (W on the LHS, no
    # transpose), biases as column vectors.
    kp = dict(
        wi=p["W_i2h"], bi=p["b_i2h"].reshape(H, 1),
        wh=p["W_h2h"], bh=p["b_h2h"].reshape(H, 1),
        wo=p["W_h2o"], bo=p["b_h2o"].reshape(ny, 1),
    )

    fwd = jax.jit(lambda xx: ann_forward(xx, kp))

    # Small shape consistent with the module: (nt, ngrid, nx).
    nt, ngrid = 8, 2
    x = jax.random.normal(ks[6], (nt, ngrid, nx), jnp.float32)
    out = jax.block_until_ready(fwd(x))
    ref = jax.block_until_ready(reference_forward(x, p))
    assert out.shape == (nt, ngrid, ny), out.shape
    err = float(jnp.max(jnp.abs(out - ref)))
    assert err < 1e-3, f"kernel/reference mismatch (single block): {err}"

    # Slightly larger case exercising the multi-step parallel grid and the
    # ragged last block (N = 384 -> two 256-row tiles, no wrapper jnp.pad).
    nt2, ngrid2 = 8, 48
    x2 = jax.random.normal(ks[7], (nt2, ngrid2, nx), jnp.float32)
    out2 = jax.block_until_ready(fwd(x2))
    ref2 = jax.block_until_ready(reference_forward(x2, p))
    err2 = float(jnp.max(jnp.abs(out2 - ref2)))
    assert err2 < 1e-3, f"kernel/reference mismatch (tiled/ragged): {err2}"

    print("KERNEL_OK")
</pallas_src>

<mosaic_0001>
module attributes {stable_mosaic.version = 11 : i64} {
  func.func @kernel(%arg0: i32, %arg1: memref<4x16xf32, #tpu.memory_space<vmem>>, %arg2: memref<32x4xf32, #tpu.memory_space<vmem>>, %arg3: memref<32x1xf32, #tpu.memory_space<vmem>>, %arg4: memref<32x32xf32, #tpu.memory_space<vmem>>, %arg5: memref<32x1xf32, #tpu.memory_space<vmem>>, %arg6: memref<2x32xf32, #tpu.memory_space<vmem>>, %arg7: memref<2x1xf32, #tpu.memory_space<vmem>>, %arg8: memref<2x16xf32, #tpu.memory_space<vmem>>) attributes {dimension_semantics = [#tpu.dimension_semantics<parallel>], iteration_bounds = array<i64: 1>, scalar_prefetch = 0 : i64, scratch_operands = 0 : i64, tpu.core_type = #tpu.core_type<tc>, window_params = [{transform_indices = @transform_0, window_bounds = array<i64: 4, 16>}, {pipeline_mode = #tpu.pipeline_mode<synchronous>, transform_indices = @transform_1, window_bounds = array<i64: 32, 4>}, {pipeline_mode = #tpu.pipeline_mode<synchronous>, transform_indices = @transform_2, window_bounds = array<i64: 32, 1>}, {pipeline_mode = #tpu.pipeline_mode<synchronous>, transform_indices = @transform_3, window_bounds = array<i64: 32, 32>}, {pipeline_mode = #tpu.pipeline_mode<synchronous>, transform_indices = @transform_4, window_bounds = array<i64: 32, 1>}, {pipeline_mode = #tpu.pipeline_mode<synchronous>, transform_indices = @transform_5, window_bounds = array<i64: 2, 32>}, {pipeline_mode = #tpu.pipeline_mode<synchronous>, transform_indices = @transform_6, window_bounds = array<i64: 2, 1>}, {transform_indices = @transform_7, window_bounds = array<i64: 2, 16>}]} {
    %c0 = arith.constant 0 : index
    %c0_0 = arith.constant 0 : index
    %0 = vector.load %arg1[%c0, %c0_0] : memref<4x16xf32, #tpu.memory_space<vmem>>, vector<4x16xf32>
    %c0_1 = arith.constant 0 : index
    %c0_2 = arith.constant 0 : index
    %1 = vector.load %arg2[%c0_1, %c0_2] : memref<32x4xf32, #tpu.memory_space<vmem>>, vector<32x4xf32>
    %cst = arith.constant dense<0.000000e+00> : vector<32x16xf32>
    %2 = tpu.matmul %1, %0, %cst {dimension_numbers = #tpu.dot_dimension_numbers<[1], [0], [0], [1], [0, 0, 1, 1], [], []>} : vector<32x4xf32>, vector<4x16xf32>, vector<32x16xf32> -> vector<32x16xf32>
    %c0_3 = arith.constant 0 : index
    %c0_4 = arith.constant 0 : index
    %3 = vector.load %arg3[%c0_3, %c0_4] : memref<32x1xf32, #tpu.memory_space<vmem>>, vector<32x1xf32>
    %4 = vector.broadcast %3 : vector<32x1xf32> to vector<32x16xf32>
    %5 = arith.addf %2, %4 : vector<32x16xf32>
    %cst_5 = arith.constant 0.000000e+00 : f32
    %6 = vector.broadcast %cst_5 : f32 to vector<32x16xf32>
    %7 = arith.maximumf %5, %6 : vector<32x16xf32>
    %c0_6 = arith.constant 0 : index
    %c0_7 = arith.constant 0 : index
    %8 = vector.load %arg4[%c0_6, %c0_7] : memref<32x32xf32, #tpu.memory_space<vmem>>, vector<32x32xf32>
    %cst_8 = arith.constant dense<0.000000e+00> : vector<32x16xf32>
    %9 = tpu.matmul %8, %7, %cst_8 {dimension_numbers = #tpu.dot_dimension_numbers<[1], [0], [0], [1], [0, 0, 1, 1], [], []>} : vector<32x32xf32>, vector<32x16xf32>, vector<32x16xf32> -> vector<32x16xf32>
    %c0_9 = arith.constant 0 : index
    %c0_10 = arith.constant 0 : index
    %10 = vector.load %arg5[%c0_9, %c0_10] : memref<32x1xf32, #tpu.memory_space<vmem>>, vector<32x1xf32>
    %11 = vector.broadcast %10 : vector<32x1xf32> to vector<32x16xf32>
    %12 = arith.addf %9, %11 : vector<32x16xf32>
    %c0_11 = arith.constant 0 : index
    %c0_12 = arith.constant 0 : index
    %13 = vector.load %arg6[%c0_11, %c0_12] : memref<2x32xf32, #tpu.memory_space<vmem>>, vector<2x32xf32>
    %cst_13 = arith.constant dense<0.000000e+00> : vector<2x16xf32>
    %14 = tpu.matmul %13, %12, %cst_13 {dimension_numbers = #tpu.dot_dimension_numbers<[1], [0], [0], [1], [0, 0, 1, 1], [], []>} : vector<2x32xf32>, vector<32x16xf32>, vector<2x16xf32> -> vector<2x16xf32>
    %c0_14 = arith.constant 0 : index
    %c0_15 = arith.constant 0 : index
    %15 = vector.load %arg7[%c0_14, %c0_15] : memref<2x1xf32, #tpu.memory_space<vmem>>, vector<2x1xf32>
    %16 = vector.broadcast %15 : vector<2x1xf32> to vector<2x16xf32>
    %17 = arith.addf %14, %16 : vector<2x16xf32>
    %c0_16 = arith.constant 0 : index
    %c0_17 = arith.constant 0 : index
    %18 = vector.load %arg8[%c0_16, %c0_17] : memref<2x16xf32, #tpu.memory_space<vmem>>, vector<2x16xf32>
    tpu.vector_store %arg8[%c0_16, %c0_17], %17 {strides = array<i32>} : memref<2x16xf32, #tpu.memory_space<vmem>>, vector<2x16xf32>,
    return
  }
  func.func @transform_0(%arg0: i32) -> (i32, i32) {
    %c0_i32 = arith.constant 0 : i32
    %c0_i32_0 = arith.constant 0 : i32
    return %c0_i32, %arg0 : i32, i32
  }
  func.func @transform_1(%arg0: i32) -> (i32, i32) {
    %c0_i32 = arith.constant 0 : i32
    %c0_i32_0 = arith.constant 0 : i32
    %c0_i32_1 = arith.constant 0 : i32
    return %c0_i32, %c0_i32_0 : i32, i32
  }
  func.func @transform_2(%arg0: i32) -> (i32, i32) {
    %c0_i32 = arith.constant 0 : i32
    %c0_i32_0 = arith.constant 0 : i32
    %c0_i32_1 = arith.constant 0 : i32
    return %c0_i32, %c0_i32_0 : i32, i32
  }
  func.func @transform_3(%arg0: i32) -> (i32, i32) {
    %c0_i32 = arith.constant 0 : i32
    %c0_i32_0 = arith.constant 0 : i32
    %c0_i32_1 = arith.constant 0 : i32
    return %c0_i32, %c0_i32_0 : i32, i32
  }
  func.func @transform_4(%arg0: i32) -> (i32, i32) {
    %c0_i32 = arith.constant 0 : i32
    %c0_i32_0 = arith.constant 0 : i32
    %c0_i32_1 = arith.constant 0 : i32
    return %c0_i32, %c0_i32_0 : i32, i32
  }
  func.func @transform_5(%arg0: i32) -> (i32, i32) {
    %c0_i32 = arith.constant 0 : i32
    %c0_i32_0 = arith.constant 0 : i32
    %c0_i32_1 = arith.constant 0 : i32
    return %c0_i32, %c0_i32_0 : i32, i32
  }
  func.func @transform_6(%arg0: i32) -> (i32, i32) {
    %c0_i32 = arith.constant 0 : i32
    %c0_i32_0 = arith.constant 0 : i32
    %c0_i32_1 = arith.constant 0 : i32
    return %c0_i32, %c0_i32_0 : i32, i32
  }
  func.func @transform_7(%arg0: i32) -> (i32, i32) {
    %c0_i32 = arith.constant 0 : i32
    %c0_i32_0 = arith.constant 0 : i32
    return %c0_i32, %arg0 : i32, i32
  }
}

</mosaic_0001>

<bundles_post_ra>
// kernel: _lambda_.1
= control target key start
LH: loop header
LB: loop body
LE: loop exit
PB: predicated region body
PF: predicated region fallthrough
CT: control target
= control target key end

     0   :  { %12 = vsyncpa [#allocation3], 0  ;;  %s448_s0 = inlined_call_operand.vmem [shape: f32[4,16], index: 0, kind: input, shape index: {}]   ;;  %s449_s1 = inlined_call_operand.hbm [shape: f32[32,4], index: 1, kind: input, shape index: {}]   ;;  %s450_s2 = inlined_call_operand.hbm [shape: f32[32,1], index: 2, kind: input, shape index: {}]   ;;  %s451_s3 = inlined_call_operand.hbm [shape: f32[32,32], index: 3, kind: input, shape index: {}]   ;;  %s452_s4 = inlined_call_operand.vmem [shape: f32[32,1], index: 4, kind: input, shape index: {}]   ;;  %s453_s5 = inlined_call_operand.vmem [shape: f32[2,32], index: 5, kind: input, shape index: {}]   ;;  %s454_s6 = inlined_call_operand.vmem [shape: f32[2,1], index: 6, kind: input, shape index: {}]   ;;  %s455_s7 = inlined_call_operand.vmem [shape: f32[2,16], index: 7, kind: output, shape index: {}]  }
   0x1   :  { %13 = vsyncpa [#allocation5], 0  ;;  %s33_s26 = sshll.u32 %s450_s2, 4  ;;  %s360_s27 = smov [#allocation4]   ;;  %s34_s26 = int_to_ptr.hbm [resolvable:$true] %s33_s26 }
   0x2   :  { %s35_s28 = sshll.u32 %s360_s27, 4  ;;  %s20_s8 = sshll.u32 %s449_s1, 4  ;;  %s36_s28 = int_to_ptr.vmem [resolvable:$true] %s35_s28  ;;  %s21_s8 = int_to_ptr.hbm [resolvable:$true] %s20_s8 }
   0x3   :  { %s361_s9 = smov 128   ;;  %s362_s10 = smov 8  }
   0x4   :  { %41 = dma.hbm_to_vmem [thread:$0]  %s34_s26, 512, %s36_s28, [#allocation5], %s361_s9, %s361_s9, %s362_s10  }
   0x5   :  { %s363_s11 = smov [#allocation2]   ;;  %s46_s15 = sshll.u32 %s451_s3, 4  ;;  %s47_s15 = int_to_ptr.hbm [resolvable:$true] %s46_s15 }
   0x6   :  { %s22_s12 = sshll.u32 %s363_s11, 4  ;;  %s364_s2 = smov [#allocation6]   ;;  %s23_s12 = int_to_ptr.vmem [resolvable:$true] %s22_s12 }
   0x7   :  { %28 = dma.hbm_to_vmem [thread:$0]  %s21_s8, 512, %s23_s12, [#allocation3], %s361_s9, %s361_s9, %s362_s10  }
   0x8   :  { %s48_s16 = sshll.u32 %s364_s2, 4  ;;  %s49_s16 = int_to_ptr.vmem [resolvable:$true] %s48_s16 }
   0x9   :  { %54 = dma.hbm_to_vmem [thread:$0]  %s47_s15, 512, %s49_s16, [#allocation5], %s361_s9, %s361_s9, %s362_s10  }
   0xa   :  { %356 = dma.done.wait [#allocation3], 512  }
   0xb   :  { %357 = vsyncadd [#allocation3], 4294966784 }
   0xc   :  { %358 = dma.done.wait [#allocation5], 1024  }
   0xd   :  { %359 = vsyncadd [#allocation5], 4294966272  ;;  %v365_v0 = vmov 0   ;;  %vm115_vm0 = vcmask 1043456   ;;  %vm102_vm1 = vcmask 31744   ;;  %v74_v2 = vld [vmem:[#allocation2] sm:$0xff] }
   0xe   :  { %282 = vset.pattern.permute.xlu1 %v365_v0  ;;  %281 = vset.pattern.permute.xlu0 %v365_v0  ;;  %v73_v1 = vld [vmem:[%s448_s0] sm:$0xf]  ;;  %v77_v3 = vld [vmem:[#allocation2 + $0x18] sm:$0xff]  ;;  %v79_v5 = vld [vmem:[#allocation4 + $0x8] sm:$0xff]  ;;  %vm180_vm2 = vcmask 261120   ;;  %vm252_vm3 = vcmask 123904  }
   0xf   :  { %283 = vset.pattern.permute.xlu2 %v365_v0  ;;  %260 = vmatpush.msk.msra.mxu0 %vm115_vm0, %v73_v1  ;;  %v81_v4 = vld [vmem:[#allocation4 + $0x18] sm:$0xff]  ;;  %v75_v6 = vld [vmem:[#allocation2 + $0x8] sm:$0xff]  ;;  %v80_v7 = vld [vmem:[#allocation4 + $0x10] sm:$0xff] }
  0x10   :  { %270 = vmatpush.msk.msra.mxu2 %vm115_vm0, %v73_v1  ;;  %261 = vmatmul.msk.f32.vlgmr.msra.gmra.mxu0 %vm102_vm1, %v74_v2  ;;  %v78_v8 = vld [vmem:[#allocation4] sm:$0xff]  ;;  %v76_v9 = vld [vmem:[#allocation2 + $0x10] sm:$0xff]  ;;  %v157_v10 = vld [vmem:[%s452_s4 + $0x8] sm:$0xff] }
  0x11   :  { %264 = vmatmul.msk.f32.vlgmr.msra.gmra.mxu2 %vm102_vm1, %v77_v3  ;;  %99 = vperm.xlu0 %281, %v81_v4   ;;  %v156_v11 = vld [vmem:[%s452_s4] sm:$0xff]  ;;  %v159_v13 = vld [vmem:[%s452_s4 + $0x18] sm:$0xff]  ;;  %v158_v20 = vld [vmem:[%s452_s4 + $0x10] sm:$0xff] }
  0x12   :  { %89 = vperm.xlu1 %282, %v79_v5   ;;  %177 = vperm.xlu2 %283, %v159_v13   ;;  %v223_v26 = vld [vmem:[%s454_s6] sm:$0x3]  ;;  %v154_v32 = vld [vmem:[#allocation6 + $0x10] sm:$0xff]  ;;  %v153_v33 = vld [vmem:[#allocation6 + $0x8] sm:$0xff] }
  0x13   :  { %v152_v31 = vld [vmem:[#allocation6] sm:$0xff]  ;;  %v155_v34 = vld [vmem:[#allocation6 + $0x18] sm:$0xff] }
  0x14   :  { %v222_v47 = vld [vmem:[%s453_s5] sm:$0x3] }
  0x18   :  { %262 = vmatmul.msk.f32.gmra.mxu0 %vm102_vm1, %v75_v6 }
  0x19   :  { %94 = vperm.xlu0 %281, %v80_v7  }
  0x1a   :  { %84 = vperm.xlu1 %282, %v78_v8   ;;  %172 = vperm.xlu2 %283, %v158_v20  }
  0x20   :  { %263 = vmatmul.msk.f32.gmra.mxu0 %vm102_vm1, %v76_v9 }
  0x21   :  { %167 = vperm.xlu0 %281, %v157_v10  }
  0x22   :  { %162 = vperm.xlu1 %282, %v156_v11   ;;  %226 = vperm.xlu2 %283, %v223_v26  }
  0x6c   :  { %v178_v35 = vpop.permute.xlu2 %177 }
  0x74   :  { %v173_v40 = vpop.permute.xlu2 %172 }
  0x7c   :  { %v227_v48 = vpop.permute.xlu2 %226 }
  0x83   :  { %v100_v14 = vpop.permute.xlu0 %99 }
  0x84   :  { %v90_v15 = vpop.permute.xlu1 %89 }
  0x8b   :  { %v95_v21 = vpop.permute.xlu0 %94 }
  0x8c   :  { %v85_v22 = vpop.permute.xlu1 %84 }
  0x8d   :  { %v136_v12 = vpop.f32.mrf.mxu0 }
  0x8e   :  { %v137_v27 = vadd.f32 %v136_v12, %v85_v22 }
  0x90   :  { %v148_v30 = vmax.f32 %v137_v27, 0.0 }
  0x93   :  { %v168_v43 = vpop.permute.xlu0 %167 }
  0x94   :  { %v145_v16 = vpop.f32.mrf.mxu2  ;;  %v163_v45 = vpop.permute.xlu1 %162 }
  0x95   :  { %v146_v17 = vadd.f32 %v145_v16, %v100_v14  ;;  %v139_v18 = vpop.f32.mrf.mxu0 }
  0x96   :  { %v140_v24 = vadd.f32 %v139_v18, %v90_v15 }
  0x97   :  { %v151_v19 = vmax.f32 %v146_v17, 0.0 }
  0x98   :  { %v149_v29 = vmax.f32 %v140_v24, 0.0 }
  0x99   :  { %205 = vmatpush.msra.mxu1 %v151_v19  ;;  %271 = vmatpush.msra.mxu3 %v151_v19 }
  0x9d   :  { %v142_v23 = vpop.f32.mrf.mxu0 }
  0x9e   :  { %v143_v25 = vadd.f32 %v142_v23, %v95_v21 }
  0xa0   :  { %v150_v28 = vmax.f32 %v143_v25, 0.0 }
  0xa2   :  { %206 = vmatpush.msra.mxu1 %v150_v28  ;;  %272 = vmatpush.msra.mxu3 %v150_v28 }
  0xa4   :  { %207 = vmatpush.msra.mxu1 %v149_v29  ;;  %273 = vmatpush.msra.mxu3 %v149_v29 }
  0xa6   :  { %208 = vmatpush.msra.mxu1 %v148_v30  ;;  %274 = vmatpush.msra.mxu3 %v148_v30 }
  0xa7   :  { %265 = vmatmul.msk.f32.vlgmr.msra.gmra.mxu1 %vm180_vm2, %v152_v31  ;;  %267 = vmatmul.msk.f32.vlgmr.msra.gmra.mxu3 %vm180_vm2, %v154_v32 }
  0xaf   :  { %266 = vmatmul.msk.f32.gmra.mxu1 %vm180_vm2, %v153_v33  ;;  %268 = vmatmul.msk.f32.gmra.mxu3 %vm180_vm2, %v155_v34 }
 0x124   :  { %v210_v36 = vpop.f32.mrf.mxu1 }
 0x125   :  { %v211_v46 = vadd.f32 %v210_v36, %v163_v45 }
 0x12a   :  { %v216_v37 = vpop.f32.mrf.mxu3 }
 0x12b   :  { %v217_v42 = vadd.f32 %v216_v37, %v173_v40 }
 0x12c   :  { %v213_v41 = vpop.f32.mrf.mxu1 }
 0x12d   :  { %v214_v44 = vadd.f32 %v213_v41, %v168_v43 }
 0x132   :  { %v219_v38 = vpop.f32.mrf.mxu3 }
 0x133   :  { %v220_v39 = vadd.f32 %v219_v38, %v178_v35 }
 0x135   :  { %244 = vmatpush.msrb.mxu2 %v220_v39 }
 0x137   :  { %245 = vmatpush.msrb.mxu2 %v217_v42 }
 0x139   :  { %246 = vmatpush.msrb.mxu2 %v214_v44 }
 0x13b   :  { %247 = vmatpush.msrb.mxu2 %v211_v46 }
 0x13c   :  { %269 = vmatmul.msk.f32.vlgmr.msrb.gmra.mxu2 %vm180_vm2, %v222_v47 }
 0x1bf   :  { %v249_v49 = vpop.f32.mrf.mxu2 }
 0x1c0   :  { %v250_v50 = vadd.f32 %v249_v49, %v227_v48 }
 0x1c2   :  { %253 = vst.msk [vmem:[%s455_s7] sm:$0x3] %vm252_vm3, %v250_v50 }
 0x1c3   :  { %258 = vsyncpa [#allocation3], 1 }
 0x1c4   :  { %259 = vsyncpa [#allocation5], 1 }

</bundles_post_ra>
